<compile_context>
chip_gen: v7x
topology: tpu7x:2x2x1
jax: 0.10.0
libtpu: 0.0.40
codegen_flags: <defaults>
</compile_context>

<pallas_src>
import numpy as np
import jax
import jax.numpy as jnp
from jax.experimental import pallas as pl
from jax.experimental.pallas import tpu as pltpu


# ----------------------------- resize weight construction (host glue) -----------------------------
def _cubic(x):
    absx = np.abs(x)
    a2 = absx ** 2
    a3 = absx ** 3
    return ((1.5 * a3 - 2.5 * a2 + 1.0) * (absx <= 1.0) +
            (-0.5 * a3 + 2.5 * a2 - 4.0 * absx + 2.0) * ((absx > 1.0) & (absx <= 2.0)))


def _resize_matrix(in_len, scale):
    """MATLAB-compatible bicubic imresize (antialiased for scale<1) as a dense (out,in) matrix."""
    out_len = int(np.ceil(in_len * scale))
    kernel_width = 4.0
    if scale < 1.0:
        kernel_width /= scale
        kern = lambda x: scale * _cubic(scale * x)
    else:
        kern = _cubic
    x = np.arange(1, out_len + 1, dtype=np.float64)
    u = x / scale + 0.5 * (1.0 - 1.0 / scale)
    left = np.floor(u - kernel_width / 2.0)
    P = int(np.ceil(kernel_width)) + 2
    ind = left[:, None] + np.arange(P, dtype=np.float64)[None, :]          # 1-based source indices
    w = kern(u[:, None] - ind)
    w = w / w.sum(axis=1, keepdims=True)
    ind_c = np.clip(ind, 1, in_len).astype(np.int64) - 1                    # replicate boundary
    W = np.zeros((out_len, in_len), dtype=np.float64)
    for i in range(out_len):
        for j in range(P):
            W[i, ind_c[i, j]] += w[i, j]
    return W.astype(np.float32)


# ----------------------------------- Pallas kernel (hot path) --------------------------------
def _consistency_kernel(x_ref, t_ref, wh_t_ref, ww_t_ref, out_ref):
    bt, h, w = x_ref.shape              # h pre-padded to a multiple of 16 (bf16 tile)
    ho = wh_t_ref.shape[1]
    wo = ww_t_ref.shape[1]              # pre-padded to a multiple of 8

    # Resize is linear -> resize the DIFFERENCE once (2 matmuls instead of 4).
    d = (x_ref[...].astype(jnp.float32) - t_ref[...].astype(jnp.float32)).astype(jnp.bfloat16)

    # W-contraction: one wide 2-D bf16 MXU matmul with f32 accumulation.
    r1 = jnp.dot(d.reshape(bt * h, w), ww_t_ref[...],
                 preferred_element_type=jnp.float32)                      # (bt*h, wo) f32

    # H-contraction: minor-dim transpose (XLU) + one wide 2-D bf16 MXU matmul.
    r1t = jnp.swapaxes(r1.reshape(bt, h, wo), 1, 2).reshape(bt * wo, h)   # free views (h%8, wo%8 == 0)
    r2 = jnp.dot(r1t.astype(jnp.bfloat16), wh_t_ref[...],
                 preferred_element_type=jnp.float32)                      # (bt*wo, ho) f32

    # Lane-dense partial per grid step: sublane reduction only; cross-lane finish in JAX.
    out_ref[...] = jnp.sum(jnp.abs(r2), axis=0).reshape(1, 1, ho)


# --------------------------------------- wrapper / glue --------------------------------------
def _round_up(x, m):
    return (x + m - 1) // m * m


def _ceil_div(a, b):
    return (a + b - 1) // b


def _vmem_capacity_bytes():
    try:
        info = pltpu.get_tpu_info()
        for name in ("vmem_capacity_bytes", "vmem_size_bytes", "vmem_bytes"):
            v = getattr(info, name, None)
            if v:
                return int(v)
    except Exception:
        pass
    return 64 * 1024 * 1024    # conservative (v7x-sized) fallback


def _vmem_plan():
    cap = _vmem_capacity_bytes()
    if cap >= 96 * 1024 * 1024:                       # v5e / v6e class (128 MiB physical)
        return 56 * 1024 * 1024, 100 * 1024 * 1024    # (slab budget, vmem_limit_bytes)
    return 20 * 1024 * 1024, 48 * 1024 * 1024         # v7x class (64 MiB physical)


def _pick_batch_tile(b, h, w, ho, wo, budget_bytes):
    """Largest bt whose padded VMEM footprint stays under the budget; >=2 blocks when b>=2."""
    wp = _round_up(w, 128)
    wop = _round_up(wo, 128)
    hl = _round_up(h, 128)
    hol = _round_up(ho, 128)
    # weights (bf16, default double-buffered) come off the top of the budget
    weight_bytes = 2 * 2 * (_round_up(h, 16) * hol + _round_up(w, 16) * wop)
    per_slab = (
        2 * (2 * 2 * h * wp)       # x & t input blocks (bf16, double-buffered)
        + 2 * h * wp               # d (bf16)
        + 4 * h * wop              # r1 (f32)
        + 4 * wo * hl              # r1 transposed (f32)
        + 2 * wo * hl              # r1 transposed cast to bf16
        + 8 * wo * hol             # r2 (f32) + |r2| temp
    )
    budget = max(budget_bytes - weight_bytes, per_slab)
    bt = max(1, min(b, budget // per_slab))
    if b >= 2:
        bt = min(bt, _ceil_div(b, 2))   # guarantee >=2 grid blocks (both v7x TensorCores get work)
    return int(bt)


def consistency_loss(inputs, targets, scale=0.5):
    """Equivalent of ConsistencyLoss(scale).forward(inputs, targets) with L1Loss (mean)."""
    n, c, h, w = inputs.shape
    wh = _resize_matrix(h, scale)              # (Ho, Hin)
    ww = _resize_matrix(w, scale)              # (Wo, Win)
    ho, wo = wh.shape[0], ww.shape[0]          # true resized dims (for the mean divisor)

    # Pad Hin to a multiple of 16 (bf16 sublane tile) with zero rows / zero weight cols,
    # and Wo to a multiple of 8 with zero output rows, so in-kernel reshapes are free views.
    h_pad = _round_up(h, 16)
    if h_pad != h:
        wh = np.pad(wh, ((0, 0), (0, h_pad - h)))
    wo_pad = _round_up(wo, 8)
    if wo_pad != wo:
        ww = np.pad(ww, ((0, wo_pad - wo), (0, 0)))

    wh_t = jnp.asarray(wh.T, dtype=jnp.bfloat16)       # (h_pad, ho)   pre-transposed on host
    ww_t = jnp.asarray(ww.T, dtype=jnp.bfloat16)       # (w, wo_pad)   pre-transposed on host

    b = n * c
    x = inputs.reshape(b, h, w).astype(jnp.bfloat16)   # bf16 streaming: halves HBM traffic
    t = targets.reshape(b, h, w).astype(jnp.bfloat16)
    if h_pad != h:
        x = jnp.pad(x, ((0, 0), (0, h_pad - h), (0, 0)))
        t = jnp.pad(t, ((0, 0), (0, h_pad - h), (0, 0)))

    slab_budget, vmem_limit = _vmem_plan()
    bt = _pick_batch_tile(b, h_pad, w, ho, wo_pad, slab_budget)
    num_blocks = _ceil_div(b, bt)
    b_pad = num_blocks * bt
    if b_pad != b:                                     # zero slabs contribute 0 to the L1 sum
        x = jnp.pad(x, ((0, b_pad - b), (0, 0), (0, 0)))
        t = jnp.pad(t, ((0, b_pad - b), (0, 0), (0, 0)))

    cost = pl.CostEstimate(
        flops=int(2 * b_pad * h_pad * w * wo_pad + 2 * b_pad * wo_pad * h_pad * ho
                  + b_pad * h_pad * w + b_pad * wo_pad * ho),
        transcendentals=0,
        bytes_accessed=int(2 * (2 * b_pad * h_pad * w)            # x, t (bf16)
                           + 2 * (h_pad * ho + w * wo_pad)        # weights (bf16)
                           + 4 * num_blocks * ho),                # partials (f32)
    )

    partials = pl.pallas_call(
        _consistency_kernel,
        out_shape=jax.ShapeDtypeStruct((num_blocks, 1, ho), jnp.float32),
        grid_spec=pltpu.PrefetchScalarGridSpec(
            num_scalar_prefetch=0,
            grid=(num_blocks,),
            in_specs=[
                pl.BlockSpec((bt, h_pad, w), lambda i: (i, 0, 0)),
                pl.BlockSpec((bt, h_pad, w), lambda i: (i, 0, 0)),
                pl.BlockSpec((h_pad, ho), lambda i: (0, 0)),
                pl.BlockSpec((w, wo_pad), lambda i: (0, 0)),
            ],
            out_specs=pl.BlockSpec((1, 1, ho), lambda i: (i, 0, 0)),
        ),
        compiler_params=pltpu.CompilerParams(
            dimension_semantics=("parallel",),
            vmem_limit_bytes=int(vmem_limit),
        ),
        cost_estimate=cost,
    )(x, t, wh_t, ww_t)

    # Finish the reduction in JAX (cross-lane sum + mean divide by the TRUE element count).
    return jnp.sum(partials) / jnp.float32(b * ho * wo)


# ------------------------------------- pure-JAX reference ------------------------------------
def _reference(inputs, targets, scale=0.5):
    _, _, h, w = inputs.shape
    wh = jnp.asarray(_resize_matrix(h, scale))
    ww = jnp.asarray(_resize_matrix(w, scale))
    ri = jnp.einsum('oh,nchw,pw->ncop', wh, inputs.astype(jnp.float32), ww)
    rt = jnp.einsum('oh,nchw,pw->ncop', wh, targets.astype(jnp.float32), ww)
    return jnp.mean(jnp.abs(ri - rt))


if __name__ == "__main__":
    key = jax.random.PRNGKey(0)
    k_in, k_tg = jax.random.split(key)
    inputs = jax.random.normal(k_in, (2, 4, 16, 16), dtype=jnp.float32)
    targets = jax.random.normal(k_tg, (2, 4, 16, 16), dtype=jnp.float32)

    loss = jax.block_until_ready(consistency_loss(inputs, targets, scale=0.5))
    ref = jax.block_until_ready(_reference(inputs, targets, scale=0.5))

    # Tolerance reflects bf16 streaming of activations/weights (f32 accumulation kept on MXU).
    assert np.allclose(np.asarray(loss), np.asarray(ref), rtol=3e-2, atol=1e-3), (loss, ref)
    print("KERNEL_OK")
</pallas_src>

<mosaic_0001>
module attributes {stable_mosaic.version = 11 : i64} {
  func.func @_consistency_kernel(%arg0: i32, %arg1: memref<4x16x16xbf16, #tpu.memory_space<vmem>>, %arg2: memref<4x16x16xbf16, #tpu.memory_space<vmem>>, %arg3: memref<16x8xbf16, #tpu.memory_space<vmem>>, %arg4: memref<16x8xbf16, #tpu.memory_space<vmem>>, %arg5: memref<1x1x8xf32, #tpu.memory_space<vmem>>) attributes {dimension_semantics = [#tpu.dimension_semantics<parallel>], iteration_bounds = array<i64: 2>, scalar_prefetch = 0 : i64, scratch_operands = 0 : i64, tpu.core_type = #tpu.core_type<tc>, window_params = [{transform_indices = @transform_0, window_bounds = array<i64: 4, 16, 16>}, {transform_indices = @transform_1, window_bounds = array<i64: 4, 16, 16>}, {pipeline_mode = #tpu.pipeline_mode<synchronous>, transform_indices = @transform_2, window_bounds = array<i64: 16, 8>}, {pipeline_mode = #tpu.pipeline_mode<synchronous>, transform_indices = @transform_3, window_bounds = array<i64: 16, 8>}, {transform_indices = @transform_4, window_bounds = array<i64: 1, 1, 8>}]} {
    %c0 = arith.constant 0 : index
    %c0_0 = arith.constant 0 : index
    %c0_1 = arith.constant 0 : index
    %0 = vector.load %arg1[%c0, %c0_0, %c0_1] : memref<4x16x16xbf16, #tpu.memory_space<vmem>>, vector<4x16x16xbf16>
    %1 = arith.extf %0 : vector<4x16x16xbf16> to vector<4x16x16xf32>
    %c0_2 = arith.constant 0 : index
    %c0_3 = arith.constant 0 : index
    %c0_4 = arith.constant 0 : index
    %2 = vector.load %arg2[%c0_2, %c0_3, %c0_4] : memref<4x16x16xbf16, #tpu.memory_space<vmem>>, vector<4x16x16xbf16>
    %3 = arith.extf %2 : vector<4x16x16xbf16> to vector<4x16x16xf32>
    %4 = arith.subf %1, %3 : vector<4x16x16xf32>
    %5 = arith.truncf %4 : vector<4x16x16xf32> to vector<4x16x16xbf16>
    %6 = vector.shape_cast %5 : vector<4x16x16xbf16> to vector<64x16xbf16>
    %c0_5 = arith.constant 0 : index
    %c0_6 = arith.constant 0 : index
    %7 = vector.load %arg4[%c0_5, %c0_6] : memref<16x8xbf16, #tpu.memory_space<vmem>>, vector<16x8xbf16>
    %cst = arith.constant dense<0.000000e+00> : vector<64x8xf32>
    %8 = tpu.matmul %6, %7, %cst {dimension_numbers = #tpu.dot_dimension_numbers<[1], [0], [0], [1], [0, 0, 1, 1], [], []>} : vector<64x16xbf16>, vector<16x8xbf16>, vector<64x8xf32> -> vector<64x8xf32>
    %9 = vector.shape_cast %8 : vector<64x8xf32> to vector<4x16x8xf32>
    %10 = tpu.transpose %9, [0, 2, 1] : vector<4x16x8xf32> -> vector<4x8x16xf32>
    %11 = vector.shape_cast %10 : vector<4x8x16xf32> to vector<32x16xf32>
    %12 = arith.truncf %11 : vector<32x16xf32> to vector<32x16xbf16>
    %c0_7 = arith.constant 0 : index
    %c0_8 = arith.constant 0 : index
    %13 = vector.load %arg3[%c0_7, %c0_8] : memref<16x8xbf16, #tpu.memory_space<vmem>>, vector<16x8xbf16>
    %cst_9 = arith.constant dense<0.000000e+00> : vector<32x8xf32>
    %14 = tpu.matmul %12, %13, %cst_9 {dimension_numbers = #tpu.dot_dimension_numbers<[1], [0], [0], [1], [0, 0, 1, 1], [], []>} : vector<32x16xbf16>, vector<16x8xbf16>, vector<32x8xf32> -> vector<32x8xf32>
    %15 = math.absf %14 : vector<32x8xf32>
    %cst_10 = arith.constant dense<0.000000e+00> : vector<8xf32>
    %16 = vector.multi_reduction <add>, %15, %cst_10 [0] : vector<32x8xf32> to vector<8xf32>
    %17 = vector.shape_cast %16 : vector<8xf32> to vector<1x1x8xf32>
    %c0_11 = arith.constant 0 : index
    %c0_12 = arith.constant 0 : index
    %c0_13 = arith.constant 0 : index
    %18 = vector.load %arg5[%c0_11, %c0_12, %c0_13] : memref<1x1x8xf32, #tpu.memory_space<vmem>>, vector<1x1x8xf32>
    tpu.vector_store %arg5[%c0_11, %c0_12, %c0_13], %17 {strides = array<i32>} : memref<1x1x8xf32, #tpu.memory_space<vmem>>, vector<1x1x8xf32>,
    return
  }
  func.func @transform_0(%arg0: i32) -> (i32, i32, i32) {
    %c0_i32 = arith.constant 0 : i32
    %c0_i32_0 = arith.constant 0 : i32
    %c0_i32_1 = arith.constant 0 : i32
    return %arg0, %c0_i32, %c0_i32_0 : i32, i32, i32
  }
  func.func @transform_1(%arg0: i32) -> (i32, i32, i32) {
    %c0_i32 = arith.constant 0 : i32
    %c0_i32_0 = arith.constant 0 : i32
    %c0_i32_1 = arith.constant 0 : i32
    return %arg0, %c0_i32, %c0_i32_0 : i32, i32, i32
  }
  func.func @transform_2(%arg0: i32) -> (i32, i32) {
    %c0_i32 = arith.constant 0 : i32
    %c0_i32_0 = arith.constant 0 : i32
    %c0_i32_1 = arith.constant 0 : i32
    return %c0_i32, %c0_i32_0 : i32, i32
  }
  func.func @transform_3(%arg0: i32) -> (i32, i32) {
    %c0_i32 = arith.constant 0 : i32
    %c0_i32_0 = arith.constant 0 : i32
    %c0_i32_1 = arith.constant 0 : i32
    return %c0_i32, %c0_i32_0 : i32, i32
  }
  func.func @transform_4(%arg0: i32) -> (i32, i32, i32) {
    %c0_i32 = arith.constant 0 : i32
    %c0_i32_0 = arith.constant 0 : i32
    %c0_i32_1 = arith.constant 0 : i32
    return %arg0, %c0_i32, %c0_i32_0 : i32, i32, i32
  }
}

</mosaic_0001>

<bundles_post_ra>
// kernel: tpu_custom_call.1
= control target key start
LH: loop header
LB: loop body
LE: loop exit
PB: predicated region body
PF: predicated region fallthrough
CT: control target
= control target key end

     0   :  { %9 = vsyncpa [#allocation3], 0  ;;  %s1266_s0 = inlined_call_operand.hbm [shape: bf16[8,16,16], index: 0, kind: input, shape index: {}]   ;;  %s1267_s1 = inlined_call_operand.hbm [shape: bf16[8,16,16], index: 1, kind: input, shape index: {}]   ;;  %s1268_s2 = inlined_call_operand.vmem [shape: bf16[16,8], index: 2, kind: input, shape index: {}]   ;;  %s1269_s3 = inlined_call_operand.vmem [shape: bf16[16,8], index: 3, kind: input, shape index: {}]   ;;  %s1270_s4 = inlined_call_operand.hbm [shape: f32[2,1,8], index: 4, kind: output, shape index: {}]  }
   0x1   :  { %11 = vsyncpa [#allocation3 + $0x1], 0 }
   0x2   :  { %12 = vsyncpa [#allocation6], 0 }
   0x3   :  { %14 = vsyncpa [#allocation6 + $0x1], 0 }
   0x4   :  { %15 = vsyncpa [#allocation4], 0 }
   0x5   :  { %17 = vsyncpa [#allocation4 + $0x1], 0  ;;  %s1032_s15 = smov 0   ;;  %s1034_s16 = smov 0  }
   0x6   :  { %s1036_s17 = smov 0   ;;  %s1038_s18 = smov 0  }
   0x7 LB: > { %s1053_s19 = sadd.s32 4294967295, %s1000_s18   ;;  %s705_s20 = sadd.s32 4294967294, %s1000_s18   ;;  %s1000_s18 = sphi %s1038_s18, %s1286_s18   ;;  %s996_s17 = sphi %s1036_s17, %s1285_s17   ;;  %s992_s16 = sphi %s1034_s16, %s1284_s16   ;;  %s988_s15 = sphi %s1032_s15, %s1283_s15  }
   0x8   : > { %s1057_s21 = sadd.s32 1, %s1000_s18   ;;  %s30_s22 = sadd.s32 1, %s996_s17 }
   0x9   : > { %s27_s23 = ssub.s32 %s1000_s18, %s1057_s21  ;;  %p37_p0 = scmp.ne.s32.totalorder %s996_s17, %s992_s16 }
   0xa   : > { %p28_p1 = scmp.eq.s32.totalorder %s27_s23, 0  ;;  %p38_p2 = scmp.eq.s32.totalorder %s1000_s18, 0 }
   0xb   : > { %p43_p3 = scmp.ne.s32.totalorder %s992_s16, %s988_s15  ;;  %p44_p4 = scmp.eq.s32.totalorder %s1053_s19, 0 }
   0xc   : > { %s1069_s24 = scalar_select %p28_p1, %s996_s17, %s30_s22  }
   0xd   : > { %p1071_p5 = por %p38_p2, %p37_p0  ;;  %p1075_p6 = por %p44_p4, %p43_p3 }
   0xe   : > { %p135_p7 = scmp.eq.s32.totalorder %s1053_s19, 1  ;;  %p141_p8 = scmp.eq.s32.totalorder %s705_s20, 1 }
   0xf   : > { %s1274_s26 = scalar_select %p1075_p6, 1, 0 }
  0x10   : > { %p813_p10 = scmp.lt.s32.totalorder %s1000_s18, 2  ;;  %p1082_p11 = por %p135_p7, %p37_p0 }
  0x11   : > { %p1086_p12 = por %p141_p8, %p43_p3  ;;  %s1091_s29 = sand.u32 1, %s996_s17  }
  0x12   : > { %s1275_s27 = scalar_select %p1082_p11, 1, 0 }
  0x13   : > { %s1276_s28 = scalar_select %p1086_p12, 1, 0 }
  0x14   : > { %s731_s30 = sshll.u32 %s1000_s18, 9  ;;  %s708_s5 = sshll.u32 %s1091_s29, 5 }
  0x15   : > { %s1100_s8 = scalar_lea.hbm %s1266_s0, %s731_s30  ;;  %s171_s9 = scalar_lea.vmem [#allocation2], %s708_s5 }
  0x16   : > { %s179_s10 = sshll.u32 %s171_s9, 4  ;;  %p1106_p13 = pnand %p813_p10, %p1071_p5  ;;  %s1110_s10 = int_to_ptr.vmem [resolvable:$true] %s179_s10 }
  0x17   : > { %s168_s12 = scalar_lea.sflag [#allocation3], %s1091_s29  ;;  %s870_s13 = scalar_lea.hbm %s1100_s8, 512 }
  0x18   : > { %p871_p0 = scmp.ne.s32.totalorder %s1100_s8, %s870_s13  ;;  %p872_p1 = pneg %p1106_p13 }
  0x19   : > { %s875_s22 = scalar_lea.hbm %s1266_s0, 1024  ;;  %p876_p4 = scmp.lt.u32.totalorder %s1100_s8, %s1266_s0 }
  0x1a   : > { %p873_p2 = pnand %p872_p1, %p871_p0  ;;  %p877_p5 = scmp.lt.u32.totalorder %s875_s22, %s870_s13 }
  0x1b   : > { %p879_p8 = scmp.lt.u32.totalorder %s870_s13, %s1100_s8 }
  0x1c   : > { %p874_p3 = pneg %p873_p2  ;;  %p878_p7 = por %p877_p5, %p876_p4 }
  0x1e   : > { %p880_p10 = por %p879_p8, %p878_p7 }
  0x20   : > { %p881_p9 = pnand %p880_p10, %p874_p3 }
  0x22   : > { %884 = shalt.err (!%p881_p9)
}
  0x23   : > { %s885_s6 = scalar_lea.vmem %s1110_s10, 512  ;;  %s1002_s7 = smov [#allocation2]  }
  0x24   : > { %p886_p0 = scmp.ne.s32.totalorder %s1110_s10, %s885_s6  ;;  %s890_s9 = sshll.u32 %s1002_s7, 4  ;;  %s891_s9 = int_to_ptr.vmem [resolvable:$false] %s890_s9 }
  0x25   : > { %s892_s14 = scalar_lea.vmem %s891_s9, 1024  ;;  %p893_p11 = scmp.lt.s32.totalorder %s1110_s10, %s891_s9 }
  0x26   : > { %p888_p2 = pnand %p886_p0, %p872_p1  ;;  %p894_p4 = scmp.lt.s32.totalorder %s892_s14, %s885_s6 }
  0x28   : > { %p889_p12 = pneg %p888_p2  ;;  %p895_p5 = por %p894_p4, %p893_p11 }
  0x2a   : > { %p896_p7 = pnand %p895_p5, %p889_p12 }
  0x2c   : > { %899 = shalt.err (!%p896_p7)
}
  0x2d   : > { %s1003_s13 = smov 64   ;;  %s1004_s20 = smov 4  }
  0x2e   : > { %805 = dma.hbm_to_vmem [thread:$0]  (!%p1106_p13), %s1100_s8, 512, %s1110_s10, %s168_s12, %s1003_s13, %s1003_s13, %s1004_s20  }
  0x2f   : > { %p716_p9 = scmp.ge.s32.totalorder %s1000_s18, 1  ;;  %p209_p11 = scmp.lt.s32.totalorder %s1000_s18, 3 }
  0x30   : > { %s1154_s6 = scalar_lea.hbm %s1267_s1, %s731_s30  ;;  %s193_s7 = scalar_lea.vmem [#allocation5], %s708_s5 }
  0x31   : > { %p1145_p12 = pnand %p716_p9, %p209_p11  ;;  %s201_s9 = sshll.u32 %s193_s7, 4  ;;  %s1158_s9 = int_to_ptr.vmem [resolvable:$true] %s201_s9 }
  0x32   : > { %s190_s8 = scalar_lea.sflag [#allocation6], %s1091_s29  ;;  %s900_s10 = scalar_lea.hbm %s1154_s6, 512 }
  0x33   : > { %p901_p3 = scmp.ne.s32.totalorder %s1154_s6, %s900_s10  ;;  %s905_s30 = scalar_lea.hbm %s1267_s1, 1024 }
  0x34   : > { %p906_p0 = scmp.lt.u32.totalorder %s1154_s6, %s1267_s1  ;;  %p907_p2 = scmp.lt.u32.totalorder %s905_s30, %s900_s10 }
  0x35   : > { %p903_p8 = pnand %p901_p3, %p872_p1  ;;  %p909_p5 = scmp.lt.u32.totalorder %s900_s10, %s1154_s6 }
  0x36   : > { %p908_p4 = por %p907_p2, %p906_p0 }
  0x37   : > { %p904_p10 = pneg %p903_p8 }
  0x38   : > { %p910_p7 = por %p909_p5, %p908_p4 }
  0x3a   : > { %p911_p9 = pnand %p910_p7, %p904_p10 }
  0x3c   : > { %914 = shalt.err (!%p911_p9)
}
  0x3d   : > { %s915_s5 = scalar_lea.vmem %s1158_s9, 512  ;;  %s1005_s7 = smov [#allocation5]  }
  0x3e   : > { %p916_p11 = scmp.ne.s32.totalorder %s1158_s9, %s915_s5  ;;  %s920_s12 = sshll.u32 %s1005_s7, 4  ;;  %s921_s12 = int_to_ptr.vmem [resolvable:$false] %s920_s12 }
  0x3f   : > { %s922_s14 = scalar_lea.vmem %s921_s12, 1024  ;;  %p923_p6 = scmp.lt.s32.totalorder %s1158_s9, %s921_s12 }
  0x40   : > { %p918_p3 = pnand %p916_p11, %p872_p1  ;;  %p924_p0 = scmp.lt.s32.totalorder %s922_s14, %s915_s5 }
  0x42   : > { %p919_p8 = pneg %p918_p3  ;;  %p925_p2 = por %p924_p0, %p923_p6 }
  0x44   : > { %p926_p4 = pnand %p925_p2, %p919_p8 }
  0x46   : > { %929 = shalt.err (!%p926_p4)
}
  0x47   : > { %808 = dma.hbm_to_vmem [thread:$0]  (!%p1106_p13), %s1154_s6, 512, %s1158_s9, %s190_s8, %s1003_s13, %s1003_s13, %s1004_s20  }
  0x48   : > { %213 = sbr.rel (%p1145_p12) target bundleno = 698 (0x2ba), region = 36  ;;  %s1192_s10 = sand.u32 (!%p1145_p12), 1, %s992_s16  }
  0x49   : > { %s717_s30 = sshll.u32 (!%p1145_p12), %s1192_s10, 5  ;;  %s216_s23 = scalar_lea.sflag (!%p1145_p12), [#allocation3], %s1192_s10 }
  0x4a   : > { %s219_s11 = scalar_lea.vmem (!%p1145_p12), [#allocation2], %s717_s30  ;;  %p1279_p6 = scmp.ne.s32.totalorder (!%p1145_p12), %s1274_s26, 0 }
  0x4f   : > { %975 = dma.done.wait (%p1279_p6), %s216_s23, 512  }
  0x50   : > { %977 = vsyncadd (%p1279_p6), %s216_s23, 4294966784  ;;  %s225_s29 = scalar_lea.sflag [#allocation6], %s1192_s10  ;;  %s228_s13 = scalar_lea.vmem [#allocation5], %s717_s30 }
  0x51   : > { %979 = dma.done.wait (%p1279_p6), %s225_s29, 512  }
  0x52   : > { %981 = vsyncadd (%p1279_p6), %s225_s29, 4294966784  ;;  %v868_v0 = vld [vmem:[%s1269_s3] sm:$0xff]   ;;  %vm312_vm0 = vcmask 130048   ;;  %v766_v3 = vld [vmem:[%s219_s11 + $0x8] sm:$0xff]   ;;  %vm587_vm1 = vcmask 64512   ;;  %s727_s9 = sshll.u32 %s1053_s19, 4 }
  0x53   : > { %v735_v1 = vld [vmem:[%s219_s11] sm:$0xff]   ;;  %780 = vmatprep.subr.bf16.mxu0 %v868_v0  ;;  %v769_v8 = vld [vmem:[%s228_s13 + $0x8] sm:$0xff]   ;;  %v767_v9 = vld [vmem:[%s219_s11 + $0x10] sm:$0xff]   ;;  %v740_v11 = vunpack.c.l.bf16 %v766_v3  ;;  %v741_v12 = vunpack.c.h.bf16 %v766_v3  ;;  %s256_s8 = scalar_lea.vmem [#allocation7], %s1192_s10  ;;  %vm601_vm2 = vcmask 57344   ;;  %s1222_s12 = scalar_lea.hbm %s1270_s4, %s727_s9 }
  0x54   : > { %v751_v2 = vld [vmem:[%s228_s13] sm:$0xff]   ;;  %v736_v4 = vunpack.c.l.bf16 %v735_v1  ;;  %v737_v5 = vunpack.c.h.bf16 %v735_v1  ;;  %v770_v10 = vld [vmem:[%s228_s13 + $0x10] sm:$0xff]   ;;  %781 = vmatpush3.bf16.msra.mxu0 %v868_v0  ;;  %v756_v13 = vunpack.c.l.bf16 %v769_v8  ;;  %v757_v14 = vunpack.c.h.bf16 %v769_v8  ;;  %v768_v15 = vld [vmem:[%s219_s11 + $0x18] sm:$0xff]   ;;  %s616_s25 = sshll.u32 %s256_s8, 4  ;;  %s604_s14 = scalar_lea.sflag [#allocation4], %s1192_s10  ;;  %s1224_s25 = int_to_ptr.vmem [resolvable:$true] %s616_s25 }
  0x55   : > { %v752_v6 = vunpack.c.l.bf16 %v751_v2  ;;  %v753_v7 = vunpack.c.h.bf16 %v751_v2  ;;  %v771_v16 = vld [vmem:[%s228_s13 + $0x18] sm:$0xff]   ;;  %v744_v19 = vunpack.c.l.bf16 %v767_v9  ;;  %v745_v20 = vunpack.c.h.bf16 %v767_v9  ;;  %v869_v48 = vld [vmem:[%s1268_s2] sm:$0xff]   ;;  %s930_s30 = scalar_lea.vmem %s1224_s25, 16  ;;  %p1280_p1 = scmp.ne.s32.totalorder %s1275_s27, 0 }
  0x56   : > { %v294_v21 = vsub.f32 %v740_v11, %v756_v13  ;;  %v295_v22 = vsub.f32 %v741_v12, %v757_v14  ;;  %v760_v23 = vunpack.c.l.bf16 %v770_v10  ;;  %v761_v24 = vunpack.c.h.bf16 %v770_v10  ;;  %790 = vmatprep.subr.bf16.mxu1 %v869_v48  ;;  %p931_p13 = scmp.ne.s32.totalorder %s1224_s25, %s930_s30  ;;  %s1006_s19 = smov [#allocation7]  }
  0x57   : > { %v292_v17 = vsub.f32 %v736_v4, %v752_v6  ;;  %v293_v18 = vsub.f32 %v737_v5, %v753_v7  ;;  %v748_v26 = vunpack.c.l.bf16 %v768_v15  ;;  %v749_v27 = vunpack.c.h.bf16 %v768_v15  ;;  %791 = vmatpush3.bf16.msra.mxu1 %v869_v48  ;;  %s934_s23 = sshll.u32 %s1006_s19, 4  ;;  %s935_s23 = int_to_ptr.vmem [resolvable:$false] %s934_s23 }
  0x58   : > { %v764_v28 = vunpack.c.l.bf16 %v771_v16  ;;  %v301_v29 = vpack.c.bf16 %v295_v22, %v294_v21  ;;  %v296_v30 = vsub.f32 %v744_v19, %v760_v23  ;;  %v297_v31 = vsub.f32 %v745_v20, %v761_v24  ;;  %p932_p12 = pnand %p931_p13, %p1280_p1  ;;  %s936_s11 = scalar_lea.vmem %s935_s23, 32 }
  0x59   : > { %v300_v25 = vpack.c.bf16 %v293_v18, %v292_v17  ;;  %v765_v32 = vunpack.c.h.bf16 %v771_v16  ;;  %p937_p5 = scmp.lt.s32.totalorder %s1224_s25, %s935_s23  ;;  %p938_p7 = scmp.lt.s32.totalorder %s936_s11, %s930_s30 }
  0x5a   : > { %v302_v33 = vpack.c.bf16 %v297_v31, %v296_v30  ;;  %v298_v34 = vsub.f32 %v748_v26, %v764_v28  ;;  %p933_p10 = pneg %p932_p12 }
  0x5b   : > { %782 = vmatprep.mubr.msk.bf16.mxu0 %vm312_vm0, %v300_v25  ;;  %v299_v35 = vsub.f32 %v749_v27, %v765_v32  ;;  %p939_p9 = por %p938_p7, %p937_p5 }
  0x5c   : > { %783 = vmatmul.mubr.msk.bf16.vlgmr.msra.gmra.mrb[0].mxu0 %vm312_vm0, %v301_v29 }
  0x5d   : > { %786 = vmatprep.mubr.msk.bf16.mxu0 %vm312_vm0, %v302_v33  ;;  %v303_v36 = vpack.c.bf16 %v299_v35, %v298_v34  ;;  %p940_p11 = pnand %p939_p9, %p933_p10 }
  0x64   : > { %787 = vmatmul.mubr.msk.bf16.gmra.mrb[4].mxu0 %vm312_vm0, %v303_v36 }
 0x12f   : > { %v784_v37 = vpop.f32.mrb[0].mxu0 }
 0x130   : > { %v359_v38 = vpop.f32.mrb[1].mxu0 }
 0x131   : > { %v785_v39 = vpop.f32.mrb[2].mxu0  ;;  %v850_v40 = vpack.i.bf16 %v784_v37, %v359_v38 }
 0x132   : > { %v362_v41 = vpop.f32.mrb[3].mxu0 }
 0x133   : > { %v852_v42 = vpack.i.bf16 %v785_v39, %v362_v41  ;;  %851 = vxpose.xlu0.b32.start [1/2] (short) (narrow) %v850_v40, 8 }
 0x137   : > { %853 = vxpose.xlu0.b32.end [2/2] (short) (narrow) %v852_v42, 8  ;;  %v788_v43 = vpop.f32.mrb[4].mxu0 }
 0x138   : > { %v375_v44 = vpop.f32.mrb[5].mxu0 }
 0x139   : > { %v789_v45 = vpop.f32.mrb[6].mxu0  ;;  %v859_v46 = vpack.i.bf16 %v788_v43, %v375_v44 }
 0x13a   : > { %v378_v47 = vpop.f32.mrb[7].mxu0 }
 0x13b   : > { %v861_v49 = vpack.i.bf16 %v789_v45, %v378_v47  ;;  %860 = vxpose.xlu1.b32.start [1/2] (short) (narrow) %v859_v46, 8 }
 0x13f   : > { %862 = vxpose.xlu1.b32.end [2/2] (short) (narrow) %v861_v49, 8 }
 0x1b3   : > { %v854_v50 = vpop.trf.xlu0 }
 0x1b4   : > { %v858_v51 = vunpack.i.h.bf16 %v854_v50  ;;  %v855_v52 = vunpack.i.l.bf16 %v854_v50 }
 0x1b6   : > { %v518_v53 = vpack.c.bf16 %v858_v51, %v855_v52 }
 0x1b8   : > { %792 = vmatprep.mubr.msk.bf16.mxu1 %vm312_vm0, %v518_v53 }
 0x1bb   : > { %v863_v54 = vpop.trf.xlu1 }
 0x1bc   : > { %v867_v55 = vunpack.i.h.bf16 %v863_v54  ;;  %v864_v56 = vunpack.i.l.bf16 %v863_v54 }
 0x1be   : > { %v519_v57 = vpack.c.bf16 %v867_v55, %v864_v56 }
 0x1c0   : > { %793 = vmatmul.mubr.msk.bf16.vlgmr.msra.gmra.mrb[0].mxu1 %vm312_vm0, %v519_v57 }
 0x293   : > { %v794_v58 = vpop.f32.mrb[0].mxu1 }
 0x294   : > { %v568_v59 = vpop.f32.mrb[1].mxu1  ;;  %v585_v63 = vand.u32 2147483647, %v794_v58 }
 0x295   : > { %v583_v60 = vand.u32 2147483647, %v568_v59  ;;  %v795_v61 = vpop.f32.mrb[2].mxu1 }
 0x296   : > { %v571_v62 = vpop.f32.mrb[3].mxu1  ;;  %v586_v2 = vand.u32 2147483647, %v795_v61  ;;  %v591_v5 = vsel %vm587_vm1, %v585_v63, 0.0 }
 0x297   : > { %v584_v0 = vand.u32 2147483647, %v571_v62  ;;  %v588_v1 = vsel %vm587_vm1, %v583_v60, 0.0 }
 0x298   : > { %v593_v7 = vsel %vm587_vm1, %v586_v2, 0.0 }
 0x299   : > { %v589_v3 = vsel %vm587_vm1, %v584_v0, 0.0 }
 0x29a   : > { %v590_v4 = vadd.f32 %v589_v3, %v588_v1 }
 0x29c   : > { %v592_v6 = vadd.f32 %v591_v5, %v590_v4 }
 0x29e   : > { %v594_v8 = vadd.f32 %v593_v7, %v592_v6 }
 0x2a0   : > { %v595_v9 = vrot.slane %v594_v8, 4 }
 0x2a2   : > { %v596_v10 = vadd.f32 %v595_v9, %v594_v8 }
 0x2a4   : > { %v597_v11 = vrot.slane %v596_v10, 2 }
 0x2a6   : > { %v598_v12 = vadd.f32 %v597_v11, %v596_v10 }
 0x2a8   : > { %v599_v13 = vrot.slane %v598_v12, 1 }
 0x2aa   : > { %v600_v14 = vadd.f32 %v599_v13, %v598_v12 }
 0x2ac   : > { %602 = vst.msk [vmem:[%s256_s8] sm:$0x1] %vm601_vm2, %v600_v14 }
 0x2ad   : > { %943 = shalt.err (!%p940_p11)
}
 0x2ae   : > { %s944_s10 = scalar_lea.hbm %s1222_s12, 16  ;;  %s948_s20 = scalar_lea.hbm %s1270_s4, 32 }
 0x2af   : > { %p945_p3 = scmp.ne.s32.totalorder %s1222_s12, %s944_s10  ;;  %p949_p2 = scmp.lt.u32.totalorder %s1222_s12, %s1270_s4 }
 0x2b0   : > { %p950_p4 = scmp.lt.u32.totalorder %s948_s20, %s944_s10  ;;  %p952_p13 = scmp.lt.u32.totalorder %s944_s10, %s1222_s12 }
 0x2b1   : > { %p946_p8 = pnand %p945_p3, %p1280_p1 }
 0x2b2   : > { %p951_p6 = por %p950_p4, %p949_p2 }
 0x2b3   : > { %p947_p0 = pneg %p946_p8 }
 0x2b4   : > { %p953_p12 = por %p952_p13, %p951_p6 }
 0x2b6   : > { %p954_p10 = pnand %p953_p12, %p947_p0 }
 0x2b8   : > { %957 = shalt.err (!%p954_p10)
}
 0x2b9   : > { %800 = dma.vmem_to_hbm [thread:$0]  (%p1280_p1), %s1224_s25, 16, %s1222_s12, %s604_s14  }
 0x2ba PF: > { %s628_s6 = sand.u32 1, %s988_s15   ;;  %p1281_p5 = scmp.ne.s32.totalorder %s1276_s28, 0 }
 0x2bb   : > { %p1282_p7 = scmp.ge.s32.totalorder %s1000_s18, 2  ;;  %s629_s9 = scalar_lea.sflag [#allocation4], %s628_s6 }
 0x2bd   : > { %p810_p9 = pnand %p1282_p7, %p1281_p5 }
 0x2bf   : > { %983 = dma.done.wait (!%p810_p9), %s629_s9, 16  }
 0x2c0   : > { %985 = vsyncadd (!%p810_p9), %s629_s9, 4294967280  ;;  %p20_p11 = scmp.ge.s32.totalorder %s1057_s21, 4   ;;  %s1283_s15 = smov %s992_s16 }
 0x2c1   : > { %s1284_s16 = smov %s996_s17  ;;  %s1285_s17 = smov %s1069_s24 }
 0x2c2   : > { %s1286_s18 = smov %s1057_s21  ;;  %22 = sbr.rel (!%p20_p11) target bundleno = 7 (0x7), region = 94 }
 0x2c9   :  { %633 = vsyncpa [#allocation3], 1 }
 0x2ca   :  { %635 = vsyncpa [#allocation3 + $0x1], 1 }
 0x2cb   :  { %636 = vsyncpa [#allocation6], 1 }
 0x2cc   :  { %638 = vsyncpa [#allocation6 + $0x1], 1 }
 0x2cd   :  { %639 = vsyncpa [#allocation4], 1 }
 0x2ce   :  { %641 = vsyncpa [#allocation4 + $0x1], 1 }

</bundles_post_ra>
